<compile_context>
chip_gen: v7x
topology: tpu7x:2x2x1
jax: 0.10.0
libtpu: 0.0.40
codegen_flags: <defaults>
</compile_context>

<pallas_src>
import jax
import jax.numpy as jnp
from jax.experimental import pallas as pl
from jax.experimental.pallas import tpu as pltpu


def _round_up(n, m):
    return ((n + m - 1) // m) * m


def column_fc_kernel(x_ref, w1_ref, b1_ref, w2_ref, b2_ref, w3_ref, b3_ref, o_ref):
    cd = w1_ref.dtype                       # compute (MXU input) dtype
    # fc1 -> relu   (drop1 = identity at inference)
    x = x_ref[...].astype(cd)               # cast in-kernel: free under the DMA
    h1 = jnp.dot(x, w1_ref[...], preferred_element_type=jnp.float32)
    h1 = jnp.maximum(h1 + b1_ref[...], 0.0)  # f32 VPU epilogue (v5e has no bf16 VPU)
    # fc2 -> relu   (drop2 = identity at inference)
    h2 = jnp.dot(h1.astype(cd), w2_ref[...], preferred_element_type=jnp.float32)
    h2 = jnp.maximum(h2 + b2_ref[...], 0.0)
    # fc3 (no activation)
    out = jnp.dot(h2.astype(cd), w3_ref[...], preferred_element_type=jnp.float32)
    o_ref[...] = (out + b3_ref[...]).astype(o_ref.dtype)
    # TODO(synk): training-mode dropout (scaled Bernoulli masks via
    # pltpu.prng_seed/prng_random_bits) not implemented; this reproduces
    # eval()/inference forward where nn.Dropout is the identity.


def _choose_tm(B, tm_max):
    """Batch tile: multiple of 16, tail waste <= one sublane group, and >=2
    tiles whenever possible so v7x megacore gets work on both TensorCores."""
    if B <= 16:
        return max(8, _round_up(B, 8))
    n_tiles = max(2, pl.cdiv(B, tm_max))
    return min(_round_up(pl.cdiv(B, n_tiles), 16), tm_max)


def column_fc_forward(x, params, *, tm_max=1024, compute_dtype=jnp.bfloat16):
    """x: [B, input_dim] f32; params: (w1,b1,w2,b2,w3,b3) with W as [in, out].

    Set compute_dtype=jnp.float32 for closer f32-PyTorch parity (the kernel is
    HBM-bound, so the extra MXU passes are hidden anyway).
    """
    w1, b1, w2, b2, w3, b3 = params
    B, in_dim = x.shape
    h1_dim = w1.shape[1]          # 256
    h2_dim = w2.shape[1]          # 128
    out_dim = w3.shape[1]         # e.g. 100

    cd = compute_dtype
    # Weight/bias prep is ~160 KB total -- negligible vs. the x/out streams
    # (in a real deployment these would be cast once and cached).
    w1_c = w1.astype(cd)
    w2_c = w2.astype(cd)
    w3_c = w3.astype(cd)
    b1_c = b1.reshape(1, h1_dim).astype(jnp.float32)
    b2_c = b2.reshape(1, h2_dim).astype(jnp.float32)
    b3_c = b3.reshape(1, out_dim).astype(jnp.float32)

    tm = _choose_tm(B, tm_max)
    grid = (pl.cdiv(B, tm),)

    pinned = lambda shape: pl.BlockSpec(shape, lambda i: (0,) * len(shape))

    flops = 2 * B * (in_dim * h1_dim + h1_dim * h2_dim + h2_dim * out_dim)
    bytes_accessed = (
        x.size * x.dtype.itemsize
        + sum(a.size * a.dtype.itemsize
              for a in (w1_c, b1_c, w2_c, b2_c, w3_c, b3_c))
        + B * out_dim * 4
    )

    out = pl.pallas_call(
        column_fc_kernel,
        out_shape=jax.ShapeDtypeStruct((B, out_dim), jnp.float32),
        grid_spec=pl.GridSpec(
            grid=grid,
            in_specs=[
                pl.BlockSpec((tm, in_dim), lambda i: (i, 0)),   # x tile, unpadded
                pinned(w1_c.shape), pinned(b1_c.shape),         # weights/biases
                pinned(w2_c.shape), pinned(b2_c.shape),         # stay VMEM-resident
                pinned(w3_c.shape), pinned(b3_c.shape),
            ],
            out_specs=pl.BlockSpec((tm, out_dim), lambda i: (i, 0)),  # unpadded out
        ),
        compiler_params=pltpu.CompilerParams(
            dimension_semantics=("parallel",),
            vmem_limit_bytes=32 * 1024 * 1024),
        cost_estimate=pl.CostEstimate(
            flops=flops, transcendentals=0, bytes_accessed=bytes_accessed),
    )(x, w1_c, b1_c, w2_c, b2_c, w3_c, b3_c)

    return out


def init_params(key, input_dim=100, output_dim=100):
    """Deterministic init mimicking nn.Linear's uniform(-1/sqrt(fan_in)) scale."""
    ks = jax.random.split(key, 6)

    def linear(kw, kb, fan_in, fan_out):
        bound = 1.0 / jnp.sqrt(jnp.float32(fan_in))
        w = jax.random.uniform(kw, (fan_in, fan_out), jnp.float32, -bound, bound)
        b = jax.random.uniform(kb, (1, fan_out), jnp.float32, -bound, bound)
        return w, b

    w1, b1 = linear(ks[0], ks[1], input_dim, 256)
    w2, b2 = linear(ks[2], ks[3], 256, 128)
    w3, b3 = linear(ks[4], ks[5], 128, output_dim)
    return (w1, b1, w2, b2, w3, b3)


def reference_forward(x, params, compute_dtype=jnp.bfloat16):
    """Pure-JAX reference with the same compute-dtype matmul / f32-accumulate math."""
    w1, b1, w2, b2, w3, b3 = params
    cd = compute_dtype
    dot = lambda a, b: jnp.dot(a.astype(cd), b.astype(cd),
                               preferred_element_type=jnp.float32)
    h1 = jnp.maximum(dot(x, w1) + b1.reshape(1, -1), 0.0)
    h2 = jnp.maximum(dot(h1, w2) + b2.reshape(1, -1), 0.0)
    return dot(h2, w3) + b3.reshape(1, -1)


if __name__ == "__main__":
    key = jax.random.PRNGKey(0)
    k_x, k_p = jax.random.split(key)

    B, input_dim, output_dim = 8, 100, 100
    x = jax.random.normal(k_x, (B, input_dim), jnp.float32)
    params = init_params(k_p, input_dim, output_dim)

    out = column_fc_forward(x, params)
    out = jax.block_until_ready(out)

    ref = reference_forward(x, params)
    assert out.shape == (B, output_dim)
    assert jnp.allclose(out, ref, atol=1e-2, rtol=1e-2), "mismatch vs reference"

    print("KERNEL_OK")
</pallas_src>

<mosaic_0001>
module attributes {stable_mosaic.version = 11 : i64} {
  func.func @column_fc_kernel(%arg0: i32, %arg1: memref<8x100xf32, #tpu.memory_space<vmem>>, %arg2: memref<100x256xbf16, #tpu.memory_space<vmem>>, %arg3: memref<1x256xf32, #tpu.memory_space<vmem>>, %arg4: memref<256x128xbf16, #tpu.memory_space<vmem>>, %arg5: memref<1x128xf32, #tpu.memory_space<vmem>>, %arg6: memref<128x100xbf16, #tpu.memory_space<vmem>>, %arg7: memref<1x100xf32, #tpu.memory_space<vmem>>, %arg8: memref<8x100xf32, #tpu.memory_space<vmem>>) attributes {dimension_semantics = [#tpu.dimension_semantics<parallel>], iteration_bounds = array<i64: 1>, scalar_prefetch = 0 : i64, scratch_operands = 0 : i64, tpu.core_type = #tpu.core_type<tc>, window_params = [{transform_indices = @transform_0, window_bounds = array<i64: 8, 100>}, {pipeline_mode = #tpu.pipeline_mode<synchronous>, transform_indices = @transform_1, window_bounds = array<i64: 100, 256>}, {pipeline_mode = #tpu.pipeline_mode<synchronous>, transform_indices = @transform_2, window_bounds = array<i64: 1, 256>}, {pipeline_mode = #tpu.pipeline_mode<synchronous>, transform_indices = @transform_3, window_bounds = array<i64: 256, 128>}, {pipeline_mode = #tpu.pipeline_mode<synchronous>, transform_indices = @transform_4, window_bounds = array<i64: 1, 128>}, {pipeline_mode = #tpu.pipeline_mode<synchronous>, transform_indices = @transform_5, window_bounds = array<i64: 128, 100>}, {pipeline_mode = #tpu.pipeline_mode<synchronous>, transform_indices = @transform_6, window_bounds = array<i64: 1, 100>}, {transform_indices = @transform_7, window_bounds = array<i64: 8, 100>}]} {
    %c0 = arith.constant 0 : index
    %c0_0 = arith.constant 0 : index
    %0 = vector.load %arg1[%c0, %c0_0] : memref<8x100xf32, #tpu.memory_space<vmem>>, vector<8x100xf32>
    %1 = arith.truncf %0 : vector<8x100xf32> to vector<8x100xbf16>
    %c0_1 = arith.constant 0 : index
    %c0_2 = arith.constant 0 : index
    %2 = vector.load %arg2[%c0_1, %c0_2] : memref<100x256xbf16, #tpu.memory_space<vmem>>, vector<100x256xbf16>
    %cst = arith.constant dense<0.000000e+00> : vector<8x256xf32>
    %3 = tpu.matmul %1, %2, %cst {dimension_numbers = #tpu.dot_dimension_numbers<[1], [0], [0], [1], [0, 0, 1, 1], [], []>} : vector<8x100xbf16>, vector<100x256xbf16>, vector<8x256xf32> -> vector<8x256xf32>
    %c0_3 = arith.constant 0 : index
    %c0_4 = arith.constant 0 : index
    %4 = vector.load %arg3[%c0_3, %c0_4] : memref<1x256xf32, #tpu.memory_space<vmem>>, vector<1x256xf32>
    %5 = vector.broadcast %4 : vector<1x256xf32> to vector<8x256xf32>
    %6 = arith.addf %3, %5 : vector<8x256xf32>
    %cst_5 = arith.constant 0.000000e+00 : f32
    %7 = vector.broadcast %cst_5 : f32 to vector<8x256xf32>
    %8 = arith.maximumf %6, %7 : vector<8x256xf32>
    %9 = arith.truncf %8 : vector<8x256xf32> to vector<8x256xbf16>
    %c0_6 = arith.constant 0 : index
    %c0_7 = arith.constant 0 : index
    %10 = vector.load %arg4[%c0_6, %c0_7] : memref<256x128xbf16, #tpu.memory_space<vmem>>, vector<256x128xbf16>
    %cst_8 = arith.constant dense<0.000000e+00> : vector<8x128xf32>
    %11 = tpu.matmul %9, %10, %cst_8 {dimension_numbers = #tpu.dot_dimension_numbers<[1], [0], [0], [1], [0, 0, 1, 1], [], []>} : vector<8x256xbf16>, vector<256x128xbf16>, vector<8x128xf32> -> vector<8x128xf32>
    %c0_9 = arith.constant 0 : index
    %c0_10 = arith.constant 0 : index
    %12 = vector.load %arg5[%c0_9, %c0_10] : memref<1x128xf32, #tpu.memory_space<vmem>>, vector<1x128xf32>
    %13 = vector.broadcast %12 : vector<1x128xf32> to vector<8x128xf32>
    %14 = arith.addf %11, %13 : vector<8x128xf32>
    %cst_11 = arith.constant 0.000000e+00 : f32
    %15 = vector.broadcast %cst_11 : f32 to vector<8x128xf32>
    %16 = arith.maximumf %14, %15 : vector<8x128xf32>
    %17 = arith.truncf %16 : vector<8x128xf32> to vector<8x128xbf16>
    %c0_12 = arith.constant 0 : index
    %c0_13 = arith.constant 0 : index
    %18 = vector.load %arg6[%c0_12, %c0_13] : memref<128x100xbf16, #tpu.memory_space<vmem>>, vector<128x100xbf16>
    %cst_14 = arith.constant dense<0.000000e+00> : vector<8x100xf32>
    %19 = tpu.matmul %17, %18, %cst_14 {dimension_numbers = #tpu.dot_dimension_numbers<[1], [0], [0], [1], [0, 0, 1, 1], [], []>} : vector<8x128xbf16>, vector<128x100xbf16>, vector<8x100xf32> -> vector<8x100xf32>
    %c0_15 = arith.constant 0 : index
    %c0_16 = arith.constant 0 : index
    %20 = vector.load %arg7[%c0_15, %c0_16] : memref<1x100xf32, #tpu.memory_space<vmem>>, vector<1x100xf32>
    %21 = vector.broadcast %20 : vector<1x100xf32> to vector<8x100xf32>
    %22 = arith.addf %19, %21 : vector<8x100xf32>
    %c0_17 = arith.constant 0 : index
    %c0_18 = arith.constant 0 : index
    %23 = vector.load %arg8[%c0_17, %c0_18] : memref<8x100xf32, #tpu.memory_space<vmem>>, vector<8x100xf32>
    tpu.vector_store %arg8[%c0_17, %c0_18], %22 {strides = array<i32>} : memref<8x100xf32, #tpu.memory_space<vmem>>, vector<8x100xf32>,
    return
  }
  func.func @transform_0(%arg0: i32) -> (i32, i32) {
    %c0_i32 = arith.constant 0 : i32
    %c0_i32_0 = arith.constant 0 : i32
    return %arg0, %c0_i32 : i32, i32
  }
  func.func @transform_1(%arg0: i32) -> (i32, i32) {
    %c0_i32 = arith.constant 0 : i32
    %c0_i32_0 = arith.constant 0 : i32
    %c0_i32_1 = arith.constant 0 : i32
    return %c0_i32, %c0_i32_0 : i32, i32
  }
  func.func @transform_2(%arg0: i32) -> (i32, i32) {
    %c0_i32 = arith.constant 0 : i32
    %c0_i32_0 = arith.constant 0 : i32
    %c0_i32_1 = arith.constant 0 : i32
    return %c0_i32, %c0_i32_0 : i32, i32
  }
  func.func @transform_3(%arg0: i32) -> (i32, i32) {
    %c0_i32 = arith.constant 0 : i32
    %c0_i32_0 = arith.constant 0 : i32
    %c0_i32_1 = arith.constant 0 : i32
    return %c0_i32, %c0_i32_0 : i32, i32
  }
  func.func @transform_4(%arg0: i32) -> (i32, i32) {
    %c0_i32 = arith.constant 0 : i32
    %c0_i32_0 = arith.constant 0 : i32
    %c0_i32_1 = arith.constant 0 : i32
    return %c0_i32, %c0_i32_0 : i32, i32
  }
  func.func @transform_5(%arg0: i32) -> (i32, i32) {
    %c0_i32 = arith.constant 0 : i32
    %c0_i32_0 = arith.constant 0 : i32
    %c0_i32_1 = arith.constant 0 : i32
    return %c0_i32, %c0_i32_0 : i32, i32
  }
  func.func @transform_6(%arg0: i32) -> (i32, i32) {
    %c0_i32 = arith.constant 0 : i32
    %c0_i32_0 = arith.constant 0 : i32
    %c0_i32_1 = arith.constant 0 : i32
    return %c0_i32, %c0_i32_0 : i32, i32
  }
  func.func @transform_7(%arg0: i32) -> (i32, i32) {
    %c0_i32 = arith.constant 0 : i32
    %c0_i32_0 = arith.constant 0 : i32
    return %arg0, %c0_i32 : i32, i32
  }
}

</mosaic_0001>

<bundles_post_ra>
// kernel: tpu_custom_call.1
= control target key start
LH: loop header
LB: loop body
LE: loop exit
PB: predicated region body
PF: predicated region fallthrough
CT: control target
= control target key end

     0   :  { %12 = vsyncpa [#allocation3], 0  ;;  %s836_s0 = inlined_call_operand.vmem [shape: f32[8,100], index: 0, kind: input, shape index: {}]   ;;  %s837_s1 = inlined_call_operand.vmem [shape: bf16[100,256], index: 1, kind: input, shape index: {}]   ;;  %s838_s2 = inlined_call_operand.vmem [shape: f32[1,256], index: 2, kind: input, shape index: {}]   ;;  %s839_s3 = inlined_call_operand.hbm [shape: bf16[256,128], index: 3, kind: input, shape index: {}]   ;;  %s840_s4 = inlined_call_operand.vmem [shape: f32[1,128], index: 4, kind: input, shape index: {}]   ;;  %s841_s5 = inlined_call_operand.vmem [shape: bf16[128,100], index: 5, kind: input, shape index: {}]   ;;  %s842_s6 = inlined_call_operand.vmem [shape: f32[1,100], index: 6, kind: input, shape index: {}]   ;;  %s843_s7 = inlined_call_operand.hbm [shape: f32[8,100], index: 7, kind: output, shape index: {}]  }
   0x1   :  { %13 = vsyncpa [#allocation4], 0  ;;  %s686_s24 = smov [#allocation2]   ;;  %s638_s28 = scalar_lea.hbm %s839_s3, 2048 }
   0x2   :  { %s25_s25 = sshll.u32 %s686_s24, 4  ;;  %p639_p0 = scmp.ne.s32.totalorder %s839_s3, %s638_s28  ;;  %s26_s25 = int_to_ptr.vmem [resolvable:$true] %s25_s25 }
   0x3   :  { %p642_p1 = scmp.lt.u32.totalorder %s638_s28, %s839_s3 }
   0x5   :  { %p644_p2 = pnand %p642_p1, %p639_p0 }
   0x7   :  { %647 = shalt.err (!%p644_p2)
}
   0x8   :  { %s648_s10 = scalar_lea.vmem %s26_s25, 2048  ;;  %p653_p4 = scmp.lt.s32.totalorder %s26_s25, %s26_s25 }
   0x9   :  { %p649_p3 = scmp.ne.s32.totalorder %s26_s25, %s648_s10  ;;  %p654_p5 = scmp.lt.s32.totalorder %s648_s10, %s648_s10 }
   0xb   :  { %p655_p6 = por %p654_p5, %p653_p4 }
   0xd   :  { %p656_p7 = pnand %p655_p6, %p649_p3 }
   0xf   :  { %659 = shalt.err (!%p656_p7)
}
  0x10   :  { %s687_s11 = smov 64   ;;  %s688_s12 = smov 4  }
  0x11   :  { %31 = dma.hbm_to_vmem [thread:$0]  %s839_s3, 2048, %s26_s25, [#allocation3], %s687_s11, %s687_s11, %s688_s12  }
  0x12   :  { %682 = dma.done.wait [#allocation3], 2048  }
  0x13   :  { %683 = vsyncadd [#allocation3], 4294965248  ;;  %v689_v0 = vmov 0   ;;  %v594_v1 = vld [vmem:[%s837_s1 + $0x4] ss:$8 sps:$4 sm:$0xff]   ;;  %v618_v15 = vld [vmem:[#allocation2 + $0x50] sm:$0xff]   ;;  %v59_v42 = vlaneseq }
  0x14   :  { %177 = vmatprep.mubr.bf16.mxu0 %v689_v0  ;;  %v596_v2 = vld [vmem:[%s837_s1] ss:$8 sps:$4 sm:$0xff]   ;;  %145 = vmatprep.subr.bf16.mxu0 %v594_v1  ;;  %v597_v3 = vld [vmem:[%s837_s1 + $0x14] ss:$8 sps:$4 sm:$0xff]   ;;  %v599_v4 = vld [vmem:[%s837_s1 + $0x10] ss:$8 sps:$4 sm:$0xff]  }
  0x15   :  { %146 = vmatpush1.bf16.msra.mxu0 %v596_v2  ;;  %v600_v5 = vld [vmem:[%s837_s1 + $0x24] ss:$8 sps:$4 sm:$0xff]   ;;  %v602_v6 = vld [vmem:[%s837_s1 + $0x20] ss:$8 sps:$4 sm:$0xff]   ;;  %v603_v7 = vld [vmem:[%s837_s1 + $0x34] ss:$8 sps:$4 sm:$0xff]  }
  0x16   :  { %147 = vmatprep.subr.bf16.mxu0 %v597_v3  ;;  %v605_v8 = vld [vmem:[%s837_s1 + $0x30] ss:$8 sps:$4 sm:$0xff]   ;;  %v614_v9 = vld [vmem:[#allocation2 + $0x40] sm:$0xff]   ;;  %v616_v13 = vld [vmem:[#allocation2 + $0x48] sm:$0xff]   ;;  %vm138_vm0 = vcmask 1041408   ;;  %vm134_vm1 = vcmask 818176  }
  0x17   :  { %v606_v10 = vld [vmem:[%s837_s1 + $0x44] ss:$8 sps:$4 sm:$0xff]   ;;  %536 = vmatprep.subr.bf16.mxu1 %v614_v9  ;;  %v608_v16 = vld [vmem:[%s837_s1 + $0x40] ss:$8 sps:$4 sm:$0xff]   ;;  %v609_v17 = vld [vmem:[%s837_s1 + $0x54] ss:$8 sps:$4 sm:$0xff]  }
  0x18   :  { %v615_v11 = vld [vmem:[#allocation2] sm:$0xff]   ;;  %v617_v14 = vld [vmem:[#allocation2 + $0x8] sm:$0xff]   ;;  %v619_v19 = vld [vmem:[#allocation2 + $0x10] sm:$0xff]   ;;  %v690_v36 = vmov 0.0   ;;  %v60_v43 = vshrl.u32 %v59_v42, 7  ;;  %vm691_vm2 = vmmov 0  }
  0x19   :  { %148 = vmatpush1.bf16.msra.mxu0 %v599_v4  ;;  %v56_v12 = vld [vmem:[%s837_s1 + $0x60] sm:$0x33]  ;;  %537 = vmatpush3.bf16.msra.mxu1 %v615_v11  ;;  %v620_v20 = vld [vmem:[#allocation2 + $0x58] sm:$0xff]   ;;  %v624_v28 = vld [vmem:[#allocation2 + $0x68] sm:$0xff]  }
  0x1a   :  { %149 = vmatprep.subr.bf16.mxu0 %v600_v5  ;;  %538 = vmatprep.subr.bf16.mxu1 %v616_v13  ;;  %v506_v18 = vcombine.low %v56_v12, %v56_v12  ;;  %v611_v21 = vld [vmem:[%s837_s1 + $0x50] ss:$8 sps:$4 sm:$0xff]   ;;  %v507_v22 = vcombine.high %v56_v12, %v56_v12  ;;  %v622_v25 = vld [vmem:[#allocation2 + $0x60] sm:$0xff]   ;;  %v625_v30 = vld [vmem:[#allocation2 + $0x28] sm:$0xff]   ;;  %v61_v44 = vsub.s32 0, %v60_v43  ;;  %v65_v46 = vsub.s32 1, %v60_v43 }
  0x1b   :  { %v621_v24 = vld [vmem:[#allocation2 + $0x18] sm:$0xff]   ;;  %v42_v26 = vld [vmem:[%s836_s0] sm:$0xff]  ;;  %v626_v31 = vld [vmem:[#allocation2 + $0x70] sm:$0xff]  }
  0x1c   :  { %v140_v23 = vsel %vm138_vm0, %v506_v18, 0  ;;  %v623_v27 = vld [vmem:[#allocation2 + $0x20] sm:$0xff]   ;;  %v43_v29 = vpack.c.bf16 %v42_v26, %v42_v26  ;;  %v627_v32 = vld [vmem:[#allocation2 + $0x30] sm:$0xff]   ;;  %v628_v33 = vld [vmem:[#allocation2 + $0x78] sm:$0xff]  }
  0x1d   :  { %150 = vmatpush1.bf16.msra.mxu0 %v602_v6  ;;  %539 = vmatpush3.bf16.msra.mxu1 %v617_v14  ;;  %v629_v34 = vld [vmem:[#allocation2 + $0x38] sm:$0xff]   ;;  %v630_v35 = vld [vmem:[%s841_s5] sm:$0xff]   ;;  %v631_v37 = vld [vmem:[%s841_s5 + $0x8] sm:$0xff]  }
  0x1e   :  { %151 = vmatprep.subr.bf16.mxu0 %v603_v7  ;;  %540 = vmatprep.subr.bf16.mxu1 %v618_v15  ;;  %v632_v38 = vld [vmem:[%s841_s5 + $0x10] sm:$0xff]   ;;  %v633_v39 = vld [vmem:[%s841_s5 + $0x18] sm:$0xff]   ;;  %v634_v40 = vld [vmem:[%s841_s5 + $0x20] sm:$0xff]  }
  0x1f   :  { %v635_v41 = vld [vmem:[%s841_s5 + $0x28] sm:$0xff]   ;;  %v57_v45 = vld [vmem:[%s838_s2] sm:$0x3]  ;;  %v636_v59 = vld [vmem:[%s841_s5 + $0x30] sm:$0xff]  }
  0x20   :  { %v62_v47 = vrot.slane %v57_v45, %v61_v44  ;;  %v66_v48 = vrot.slane %v57_v45, %v65_v46  ;;  %v637_v60 = vld [vmem:[%s841_s5 + $0x38] sm:$0xff]   ;;  %v510_v62 = vld [vmem:[%s840_s4] ss:$0 sm:$0xff]  ;;  %s692_s5 = smov [#allocation5]  }
  0x21   :  { %152 = vmatpush1.bf16.msra.mxu0 %v605_v8  ;;  %541 = vmatpush3.bf16.msra.mxu1 %v619_v19  ;;  %v527_v6 = vld [vmem:[%s842_s6] ss:$0 sm:$0xff]  ;;  %s485_s14 = sshll.u32 %s692_s5, 4  ;;  %s486_s14 = int_to_ptr.vmem [resolvable:$true] %s485_s14 }
  0x22   :  { %153 = vmatprep.subr.bf16.mxu0 %v606_v10  ;;  %542 = vmatprep.subr.bf16.mxu1 %v620_v20  ;;  %s660_s4 = scalar_lea.vmem %s486_s14, 128  ;;  %p665_p9 = scmp.lt.s32.totalorder %s486_s14, %s486_s14 }
  0x23   :  { %p661_p8 = scmp.ne.s32.totalorder %s486_s14, %s660_s4  ;;  %p666_p10 = scmp.lt.s32.totalorder %s660_s4, %s660_s4 }
  0x25   :  { %154 = vmatpush1.bf16.msra.mxu0 %v608_v16  ;;  %543 = vmatpush3.bf16.msra.mxu1 %v621_v24  ;;  %p667_p11 = por %p666_p10, %p665_p9 }
  0x26   :  { %155 = vmatprep.subr.bf16.mxu0 %v609_v17  ;;  %544 = vmatprep.subr.bf16.mxu1 %v622_v25 }
  0x27   :  { %p668_p12 = pnand %p667_p11, %p661_p8 }
  0x29   :  { %156 = vmatpush1.bf16.msra.mxu0 %v611_v21  ;;  %545 = vmatpush3.bf16.msra.mxu1 %v623_v27 }
  0x2a   :  { %508 = vmatprep.subr.msk.bf16.mxu0 %vm138_vm0, %v507_v22  ;;  %546 = vmatprep.subr.bf16.mxu1 %v624_v28 }
  0x2d   :  { %158 = vmatpush1.bf16.msra.mxu0 %v140_v23  ;;  %547 = vmatpush3.bf16.msra.mxu1 %v625_v30 }
  0x2e   :  { %548 = vmatprep.subr.bf16.mxu1 %v626_v31  ;;  %567 = vmatprep.subr.bf16.mxu0 %v690_v36 }
  0x30   :  { %509 = vmatmul.mubr.msk.bf16.vlgmr.msra.gmra.mrb[0].mxu0 %vm134_vm1, %v43_v29 }
  0x31   :  { %549 = vmatpush3.bf16.msra.mxu1 %v627_v32  ;;  %568 = vmatpush3.bf16.msra.mxu0 %v630_v35 }
  0x32   :  { %550 = vmatprep.subr.bf16.mxu1 %v628_v33  ;;  %569 = vmatprep.subr.bf16.mxu0 %v690_v36 }
  0x33   :  { %583 = vmatprep.mubr.msk.bf16.mxu0 %vm691_vm2, %v690_v36 }
  0x35   :  { %551 = vmatpush3.bf16.msra.mxu1 %v629_v34  ;;  %570 = vmatpush3.bf16.msra.mxu0 %v631_v37 }
  0x36   :  { %571 = vmatprep.subr.bf16.mxu0 %v690_v36 }
  0x39   :  { %572 = vmatpush3.bf16.msra.mxu0 %v632_v38 }
  0x3a   :  { %573 = vmatprep.subr.bf16.mxu0 %v690_v36 }
  0x3d   :  { %574 = vmatpush3.bf16.msra.mxu0 %v633_v39 }
  0x3e   :  { %575 = vmatprep.subr.bf16.mxu0 %v690_v36 }
  0x41   :  { %576 = vmatpush3.bf16.msra.mxu0 %v634_v40 }
  0x42   :  { %577 = vmatprep.subr.bf16.mxu0 %v690_v36 }
  0x45   :  { %578 = vmatpush3.bf16.msra.mxu0 %v635_v41 }
  0x46   :  { %579 = vmatprep.subr.bf16.mxu0 %v690_v36 }
  0x49   :  { %580 = vmatpush3.bf16.msra.mxu0 %v636_v59 }
  0x4a   :  { %581 = vmatprep.subr.bf16.mxu0 %v690_v36 }
  0x4d   :  { %582 = vmatpush3.bf16.msra.mxu0 %v637_v60 }
 0x103   :  { %v179_v49 = vpop.f32.mrb[0].mxu0 }
 0x104   :  { %v180_v50 = vadd.f32 %v179_v49, %v62_v47  ;;  %v181_v51 = vpop.f32.mrb[1].mxu0 }
 0x105   :  { %v182_v52 = vadd.f32 %v181_v51, %v66_v48  ;;  %v183_v53 = vpop.f32.mrb[2].mxu0 }
 0x106   :  { %v186_v54 = vmax.f32 %v180_v50, 0.0  ;;  %v184_v55 = vpop.f32.mrb[3].mxu0 }
 0x107   :  { %v187_v56 = vmax.f32 %v182_v52, 0.0 }
 0x108   :  { %v188_v58 = vpack.c.bf16 %v186_v54, %v186_v54 }
 0x109   :  { %v189_v57 = vpack.c.bf16 %v187_v56, %v187_v56 }
 0x10b   :  { %357 = vmatprep.mubr.bf16.mxu1 %v189_v57 }
 0x10c   :  { %358 = vmatmul.mubr.bf16.vlgmr.msra.gmra.mrb[0].mxu1 %v188_v58 }
 0x1df   :  { %v552_v61 = vpop.f32.mrb[0].mxu1 }
 0x1e0   :  { %v553_v63 = vpop.f32.mrb[1].mxu1 }
 0x1e1   :  { %v554_v0 = vadd.f32 %v553_v63, %v552_v61  ;;  %v555_v1 = vpop.f32.mrb[2].mxu1 }
 0x1e2   :  { %v556_v2 = vpop.f32.mrb[3].mxu1 }
 0x1e3   :  { %v360_v3 = vadd.f32 %v554_v0, %v510_v62 }
 0x1e5   :  { %v365_v4 = vmax.f32 %v360_v3, 0.0 }
 0x1e7   :  { %v366_v5 = vpack.c.bf16 %v365_v4, %v365_v4 }
 0x1e9   :  { %584 = vmatmul.mubr.bf16.vlgmr.msra.gmra.mrb[4].mxu0 %v366_v5 }
 0x2bc   :  { %v472_v7 = vpop.f32.mrb[4].mxu0 }
 0x2bd   :  { %v473_v8 = vadd.f32 %v527_v6, %v472_v7  ;;  %v585_v9 = vpop.f32.mrb[5].mxu0 }
 0x2be   :  { %v475_v10 = vpop.f32.mrb[6].mxu0 }
 0x2bf   :  { %478 = vst.msk [vmem:[#allocation5] sm:$0xff] %vm134_vm1, %v473_v8  ;;  %v586_v11 = vpop.f32.mrb[7].mxu0 }
 0x2c0   :  { %671 = shalt.err (!%p668_p12)
}
 0x2c1   :  { %s672_s6 = scalar_lea.hbm %s843_s7, 128 }
 0x2c2   :  { %p673_p13 = scmp.ne.s32.totalorder %s843_s7, %s672_s6  ;;  %p676_p0 = scmp.lt.u32.totalorder %s672_s6, %s843_s7 }
 0x2c4   :  { %p678_p1 = pnand %p676_p0, %p673_p13 }
 0x2c6   :  { %681 = shalt.err (!%p678_p1)
}
 0x2c7   :  { %488 = dma.vmem_to_hbm [thread:$0]  %s486_s14, 128, %s843_s7, [#allocation4]  }
 0x2c8   :  { %684 = dma.done.wait [#allocation4], 128  }
 0x2c9   :  { %685 = vsyncadd [#allocation4], 4294967168 }
 0x2ca   :  { %492 = vsyncpa [#allocation3], 1 }
 0x2cb   :  { %493 = vsyncpa [#allocation4], 1 }

</bundles_post_ra>
